<compile_context>
chip_gen: v7x
topology: tpu7x:2x2x1
jax: 0.10.0
libtpu: 0.0.40
codegen_flags: <defaults>
</compile_context>

<pallas_src>
import functools

import jax
import jax.numpy as jnp
from jax import lax
from jax.experimental import pallas as pl
from jax.experimental.pallas import tpu as pltpu

LANE = 128
SUBLANE = 8
# ~5 (C, cw) f32 arrays (3 carries + score + onehot) stay live across the chunk
# loop; keep them to ~24 vregs so temporaries + unroll=2 fit the 64-vreg file.
_LIVE_VREG_BUDGET = 24
# Double-buffered score+label tiles kept under this, which in turn sits under the
# 32 MiB scoped-VMEM limit we request (safe on v5e/v6e/v7x).
_VMEM_BYTES_BUDGET = 26 * 1024 * 1024


def _round_up(x, m):
    return ((x + m - 1) // m) * m


def _looks_like_v7x():
    """Best-effort chip sniff (v7x: 2 TensorCores/chip, ~3.2 TB/s HBM, 64 MiB VMEM)."""
    try:
        kind = jax.devices()[0].device_kind.lower()
    except Exception:
        return False
    return ("v7" in kind) or ("7x" in kind)


def _choose_tiles(hw, c, itemsize, label_itemsize, big_tiles):
    """Pick (inner chunk width cw, grid-step tile lt) along the flattened spatial axis."""
    lane_hw = _round_up(hw, LANE)

    # Vreg-budget-aware chunk width: 5 live (C, cw) arrays cost 5*ceil(C/8)*(cw/128)
    # vregs (sublane padding counted), so C <= 8 -> cw = 512, C <= 16 -> 256, else 128.
    sub = (c + SUBLANE - 1) // SUBLANE
    lanes = max(1, _LIVE_VREG_BUDGET // (5 * sub))
    cw = max(LANE, min(lanes * LANE, lane_hw))
    # TODO(synk): for very large C (> ~64) the (C, cw) accumulators exceed the vreg
    # file even at cw=128; process classes in sub-blocks of <=64 inside the chunk loop.

    # Grid-step tile: big enough that the streaming DMA dwarfs the ~0.35 us per-step
    # pipeline overhead. On v7x (~3.2 TB/s) use ~6 MiB; on v5e/v6e a ~2 MiB tile
    # already takes >2 us. Clamp so double-buffered tiles stay inside the VMEM budget.
    target_bytes = (6 if big_tiles else 2) * 1024 * 1024
    bytes_per_col = c * itemsize + label_itemsize
    vmem_cap_cols = _VMEM_BYTES_BUDGET // (2 * bytes_per_col)
    n_chunks = min(target_bytes // max(1, c * cw * itemsize),
                   max(1, vmem_cap_cols // cw),
                   pl.cdiv(lane_hw, cw))
    n_chunks = max(1, int(n_chunks))
    return cw, cw * n_chunks


def _dice_sums_kernel(score_ref, label_ref, out_ref, *,
                      hw, lt, cw, split_tiles, softmax, masked):
    """Accumulate per-class lane-partials of [sum(s*t), sum(t), sum(s*s)].

    score_ref : (1, C, lt)       predictions for one (batch, spatial-tile) block
    label_ref : (1, 1, lt)       integer class labels
    out_ref   : (1, 1, 3, C, cw) f32 lane-partial accumulator, resident across the
                                 spatial-tile grid axis (reduced in JAX afterwards)
    """
    sp = pl.program_id(1)
    t = pl.program_id(2)

    @pl.when(t == 0)
    def _init():
        out_ref[...] = jnp.zeros_like(out_ref)

    C = score_ref.shape[1]
    n_chunks = lt // cw
    # (C, 1) class-id column; the broadcast happens inside the `==`, so no (C, cw)
    # iota stays pinned in vregs for the whole loop.
    cls = lax.broadcasted_iota(jnp.int32, (C, 1), 0)
    # Logical spatial-tile index. The index_map clamps the HBM block read; `rem`
    # keeps the arithmetic exact so duplicated / ragged columns are masked to zero.
    tile = sp * split_tiles + t
    rem = hw - tile * lt          # valid columns in this tile (may be <= 0)

    def body(j, carry):
        inter, ysum, zsum = carry
        off = pl.multiple_of(j * cw, cw)
        s = score_ref[0, :, pl.ds(off, cw)].astype(jnp.float32)     # (C, cw)
        lab = label_ref[0, :, pl.ds(off, cw)].astype(jnp.int32)     # (1, cw)

        if softmax:
            # Fused softmax over the class (sublane) axis; the denominator reciprocal
            # runs on the EUP (approx mode), off the binding VPU slot.
            m = jnp.max(s, axis=0, keepdims=True)
            e = jnp.exp(s - m)
            s = e * pl.reciprocal(jnp.sum(e, axis=0, keepdims=True), approx=True)

        if masked:
            # Hoisted ragged-tail handling: only chunks that straddle `rem` build the
            # column mask; interior chunks take the cheap identity branch.
            def _mask(args):
                s_m, lab_m = args
                valid = lax.broadcasted_iota(jnp.int32, (1, cw), 1) < (rem - off)
                # s must be masked (for zsum / post-softmax garbage); labels are
                # masked as (1, cw) so the one-hot never matches a garbage column.
                return jnp.where(valid, s_m, 0.0), jnp.where(valid, lab_m, -1)

            s, lab = lax.cond(off + cw > rem, _mask, lambda args: args, (s, lab))

        onehot = lab == cls                             # (C, cw) via broadcast
        inter = inter + jnp.where(onehot, s, 0.0)       # sum(score * target)
        ysum = ysum + onehot.astype(jnp.float32)        # sum(target)   (t == t*t)
        zsum = zsum + s * s                             # sum(score * score)
        return inter, ysum, zsum

    zero = jnp.zeros((C, cw), jnp.float32)
    inter, ysum, zsum = lax.fori_loop(0, n_chunks, body, (zero, zero, zero),
                                      unroll=min(n_chunks, 2))

    # One VMEM read-modify-write per grid step; cross-lane reduction of these
    # partials is deferred to JAX on the tiny (B, nsplit, 3, C, cw) output.
    out_ref[0, 0, 0, :, :] += inter
    out_ref[0, 0, 1, :, :] += ysum
    out_ref[0, 0, 2, :, :] += zsum


@functools.partial(jax.jit, static_argnames=("n_classes", "softmax"))
def dice_loss_pallas(inputs, target, n_classes, weight=None, softmax=False):
    """Matches DiceLoss.forward: inputs [B,C,H,W] float, target [B,H,W] int."""
    B, C, H, W = inputs.shape
    assert C == n_classes, f"predict C={C} & n_classes={n_classes} do not match"
    HW = H * W

    score = inputs.reshape(B, C, HW)                 # free reshape, no extra HBM pass
    # Labels are consumed in their stored dtype (store int8 upstream when C <= 127 to
    # cut label HBM traffic 4x); casting here would add a full read+write pass.
    if target.dtype not in (jnp.int8, jnp.int16, jnp.int32, jnp.uint8):
        target = target.astype(jnp.int32)
    labels = target.reshape(B, 1, HW)                # free reshape

    is_v7x = _looks_like_v7x()
    cw, lt = _choose_tiles(HW, C, jnp.dtype(score.dtype).itemsize,
                           jnp.dtype(labels.dtype).itemsize, big_tiles=is_v7x)
    num_t = pl.cdiv(HW, lt)

    # B == 1 on a two-TensorCore chip: split the spatial-tile range across a second
    # "parallel" grid axis so both cores are busy; each half owns its own partial
    # slab and any duplicate / ragged tail columns are masked to zero in the kernel.
    nsplit = 2 if (B == 1 and num_t >= 2 and is_v7x) else 1
    split_tiles = pl.cdiv(num_t, nsplit)
    masked = (nsplit * split_tiles * lt) != HW       # only emit masks when needed

    def tile_index(sp, t):
        # Clamp so HBM block reads never run past the array; the kernel zeroes the
        # duplicated columns via `rem`.
        return jnp.minimum(sp * split_tiles + t, num_t - 1)

    kernel = functools.partial(_dice_sums_kernel, hw=HW, lt=lt, cw=cw,
                               split_tiles=split_tiles,
                               softmax=bool(softmax), masked=masked)

    partials = pl.pallas_call(
        kernel,
        out_shape=jax.ShapeDtypeStruct((B, nsplit, 3, C, cw), jnp.float32),
        grid_spec=pltpu.PrefetchScalarGridSpec(
            num_scalar_prefetch=0,
            grid=(B, nsplit, split_tiles),           # reduction axis last
            in_specs=[
                pl.BlockSpec((1, C, lt), lambda b, sp, t: (b, 0, tile_index(sp, t))),
                pl.BlockSpec((1, 1, lt), lambda b, sp, t: (b, 0, tile_index(sp, t))),
            ],
            out_specs=pl.BlockSpec((1, 1, 3, C, cw),
                                   lambda b, sp, t: (b, sp, 0, 0, 0)),
        ),
        compiler_params=pltpu.CompilerParams(
            dimension_semantics=("parallel", "parallel", "arbitrary"),
            vmem_limit_bytes=32 * 1024 * 1024),
    )(score, labels)

    # Tiny final reduction + dice formula in plain JAX.
    sums = jnp.sum(partials, axis=(0, 1, 4))          # (3, C)
    intersect, y_sum, z_sum = sums[0], sums[1], sums[2]
    smooth = 1e-05
    dice_coef = (2.0 * intersect + smooth) / (z_sum + y_sum + smooth)
    per_class_loss = 1.0 - dice_coef

    if weight is None:
        weight = jnp.ones((n_classes,), jnp.float32)
    else:
        weight = jnp.asarray(weight, jnp.float32)
    return jnp.sum(per_class_loss * weight) / n_classes


def _reference(inputs, target, n_classes, softmax=False):
    """Pure-JAX reference mirroring the PyTorch module."""
    if softmax:
        inputs = jax.nn.softmax(inputs, axis=1)
    one_hot = (target[:, None, :, :] ==
               jnp.arange(n_classes)[None, :, None, None]).astype(jnp.float32)
    smooth = 1e-05
    loss = 0.0
    for i in range(n_classes):
        s = inputs[:, i].astype(jnp.float32)
        t = one_hot[:, i]
        inter = jnp.sum(s * t)
        y = jnp.sum(t * t)
        z = jnp.sum(s * s)
        loss += 1.0 - (2 * inter + smooth) / (z + y + smooth)
    return loss / n_classes


if __name__ == "__main__":
    key = jax.random.PRNGKey(0)
    k1, k2, k3, k4 = jax.random.split(key, 4)

    # Case 1: aligned spatial size, fused softmax. The softmax denominator uses the
    # EUP approximate reciprocal, so compare with a slightly loose tolerance.
    B, C, H, W = 2, 4, 16, 16
    logits = jax.random.normal(k1, (B, C, H, W), dtype=jnp.float32)
    target = jax.random.randint(k2, (B, H, W), 0, C, dtype=jnp.int32)
    loss = jax.block_until_ready(
        dice_loss_pallas(logits, target, n_classes=C, softmax=True))
    ref = _reference(logits, target, C, softmax=True)
    assert jnp.allclose(loss, ref, rtol=5e-3, atol=5e-3), (loss, ref)

    # Case 2: ragged spatial tail (H*W not a multiple of 128), B=1, no softmax
    # (exercises the hoisted lax.cond tail-mask path; exact math -> tight tolerance).
    B2, C2, H2, W2 = 1, 3, 15, 15
    probs = jax.nn.sigmoid(jax.random.normal(k3, (B2, C2, H2, W2), dtype=jnp.float32))
    tgt2 = jax.random.randint(k4, (B2, H2, W2), 0, C2, dtype=jnp.int32)
    loss2 = jax.block_until_ready(
        dice_loss_pallas(probs, tgt2, n_classes=C2, softmax=False))
    ref2 = _reference(probs, tgt2, C2, softmax=False)
    assert jnp.allclose(loss2, ref2, rtol=1e-5, atol=1e-5), (loss2, ref2)

    print("KERNEL_OK")
</pallas_src>

<mosaic_0001>
module attributes {stable_mosaic.version = 11 : i64} {
  func.func @_dice_sums_kernel(%arg0: i32, %arg1: i32, %arg2: i32, %arg3: memref<1x4x256xf32, #tpu.memory_space<vmem>>, %arg4: memref<1x1x256xi32, #tpu.memory_space<vmem>>, %arg5: memref<1x1x3x4x256xf32, #tpu.memory_space<vmem>>) attributes {dimension_semantics = [#tpu.dimension_semantics<parallel>, #tpu.dimension_semantics<parallel>, #tpu.dimension_semantics<arbitrary>], iteration_bounds = array<i64: 2, 1, 1>, scalar_prefetch = 0 : i64, scratch_operands = 0 : i64, tpu.core_type = #tpu.core_type<tc>, window_params = [{transform_indices = @transform_0, window_bounds = array<i64: 1, 4, 256>}, {transform_indices = @transform_1, window_bounds = array<i64: 1, 1, 256>}, {transform_indices = @transform_2, window_bounds = array<i64: 1, 1, 3, 4, 256>}]} {
    %c0_i32 = arith.constant 0 : i32
    %0 = arith.cmpi eq, %arg2, %c0_i32 : i32
    %1 = arith.extui %0 : i1 to i32
    %c0_i32_0 = arith.constant 0 : i32
    %2 = arith.cmpi ne, %1, %c0_i32_0 : i32
    scf.if %2 {
      %cst_36 = arith.constant 0.000000e+00 : f32
      %52 = vector.broadcast %cst_36 : f32 to vector<1x1x3x4x256xf32>
      %c0_37 = arith.constant 0 : index
      %c0_38 = arith.constant 0 : index
      %c0_39 = arith.constant 0 : index
      %c0_40 = arith.constant 0 : index
      %c0_41 = arith.constant 0 : index
      %53 = vector.load %arg5[%c0_37, %c0_38, %c0_39, %c0_40, %c0_41] : memref<1x1x3x4x256xf32, #tpu.memory_space<vmem>>, vector<1x1x3x4x256xf32>
      tpu.vector_store %arg5[%c0_37, %c0_38, %c0_39, %c0_40, %c0_41], %52 {strides = array<i32>} : memref<1x1x3x4x256xf32, #tpu.memory_space<vmem>>, vector<1x1x3x4x256xf32>,
    } else {
    }
    %3 = tpu.iota {dimensions = array<i32: 0>} : vector<4x1xi32>
    %cst = arith.constant 0.000000e+00 : f32
    %4 = vector.broadcast %cst : f32 to vector<4x256xf32>
    %c0_i32_1 = arith.constant 0 : i32
    %c256_i32 = arith.constant 256 : i32
    %5 = arith.muli %c0_i32_1, %c256_i32 : i32
    %6 = tpu.assume_multiple %5, 256 : i32
    %c0 = arith.constant 0 : index
    %c0_2 = arith.constant 0 : index
    %7 = arith.index_cast %6 : i32 to index
    %8 = vector.load %arg3[%c0, %c0_2, %7] : memref<1x4x256xf32, #tpu.memory_space<vmem>>, vector<1x4x256xf32>
    %9 = vector.shape_cast %8 : vector<1x4x256xf32> to vector<4x256xf32>
    %c0_3 = arith.constant 0 : index
    %c0_4 = arith.constant 0 : index
    %10 = arith.index_cast %6 : i32 to index
    %11 = vector.load %arg4[%c0_3, %c0_4, %10] : memref<1x1x256xi32, #tpu.memory_space<vmem>>, vector<1x1x256xi32>
    %12 = vector.shape_cast %11 : vector<1x1x256xi32> to vector<1x256xi32>
    %cst_5 = arith.constant dense<0xFF800000> : vector<256xf32>
    %13 = vector.multi_reduction <maximumf>, %9, %cst_5 [0] : vector<4x256xf32> to vector<256xf32>
    %14 = vector.shape_cast %13 : vector<256xf32> to vector<1x256xf32>
    %15 = vector.broadcast %14 : vector<1x256xf32> to vector<4x256xf32>
    %16 = arith.subf %9, %15 : vector<4x256xf32>
    %17 = math.exp %16 : vector<4x256xf32>
    %cst_6 = arith.constant dense<0.000000e+00> : vector<256xf32>
    %18 = vector.multi_reduction <add>, %17, %cst_6 [0] : vector<4x256xf32> to vector<256xf32>
    %19 = vector.shape_cast %18 : vector<256xf32> to vector<1x256xf32>
    %20 = tpu.reciprocal %19 {approx = true} : vector<1x256xf32> -> vector<1x256xf32>
    %21 = vector.broadcast %20 : vector<1x256xf32> to vector<4x256xf32>
    %22 = arith.mulf %17, %21 : vector<4x256xf32>
    %23 = vector.broadcast %12 : vector<1x256xi32> to vector<4x256xi32>
    %24 = vector.broadcast %3 : vector<4x1xi32> to vector<4x256xi32>
    %25 = arith.cmpi eq, %23, %24 : vector<4x256xi32>
    %cst_7 = arith.constant 0.000000e+00 : f32
    %26 = vector.broadcast %cst_7 : f32 to vector<4x256xf32>
    %27 = arith.select %25, %22, %26 : vector<4x256xi1>, vector<4x256xf32>
    %28 = arith.addf %4, %27 : vector<4x256xf32>
    %29 = arith.extui %25 : vector<4x256xi1> to vector<4x256xi32>
    %30 = arith.sitofp %29 : vector<4x256xi32> to vector<4x256xf32>
    %31 = arith.addf %4, %30 : vector<4x256xf32>
    %32 = arith.mulf %22, %22 : vector<4x256xf32>
    %33 = arith.addf %4, %32 : vector<4x256xf32>
    %c1_i32 = arith.constant 1 : i32
    %c0_8 = arith.constant 0 : index
    %c0_9 = arith.constant 0 : index
    %c0_10 = arith.constant 0 : index
    %c0_11 = arith.constant 0 : index
    %c0_12 = arith.constant 0 : index
    %34 = vector.load %arg5[%c0_8, %c0_9, %c0_10, %c0_11, %c0_12] : memref<1x1x3x4x256xf32, #tpu.memory_space<vmem>>, vector<1x1x1x4x256xf32>
    %35 = vector.shape_cast %34 : vector<1x1x1x4x256xf32> to vector<4x256xf32>
    %36 = arith.addf %35, %28 : vector<4x256xf32>
    %c0_13 = arith.constant 0 : index
    %c0_14 = arith.constant 0 : index
    %c0_15 = arith.constant 0 : index
    %c0_16 = arith.constant 0 : index
    %c0_17 = arith.constant 0 : index
    %37 = vector.load %arg5[%c0_13, %c0_14, %c0_15, %c0_16, %c0_17] : memref<1x1x3x4x256xf32, #tpu.memory_space<vmem>>, vector<1x1x1x4x256xf32>
    %38 = vector.shape_cast %37 : vector<1x1x1x4x256xf32> to vector<4x256xf32>
    %39 = vector.shape_cast %36 : vector<4x256xf32> to vector<1x1x1x4x256xf32>
    tpu.vector_store %arg5[%c0_13, %c0_14, %c0_15, %c0_16, %c0_17], %39 {strides = array<i32>} : memref<1x1x3x4x256xf32, #tpu.memory_space<vmem>>, vector<1x1x1x4x256xf32>,
    %c0_18 = arith.constant 0 : index
    %c0_19 = arith.constant 0 : index
    %c1 = arith.constant 1 : index
    %c0_20 = arith.constant 0 : index
    %c0_21 = arith.constant 0 : index
    %40 = vector.load %arg5[%c0_18, %c0_19, %c1, %c0_20, %c0_21] : memref<1x1x3x4x256xf32, #tpu.memory_space<vmem>>, vector<1x1x1x4x256xf32>
    %41 = vector.shape_cast %40 : vector<1x1x1x4x256xf32> to vector<4x256xf32>
    %42 = arith.addf %41, %31 : vector<4x256xf32>
    %c0_22 = arith.constant 0 : index
    %c0_23 = arith.constant 0 : index
    %c1_24 = arith.constant 1 : index
    %c0_25 = arith.constant 0 : index
    %c0_26 = arith.constant 0 : index
    %43 = vector.load %arg5[%c0_22, %c0_23, %c1_24, %c0_25, %c0_26] : memref<1x1x3x4x256xf32, #tpu.memory_space<vmem>>, vector<1x1x1x4x256xf32>
    %44 = vector.shape_cast %43 : vector<1x1x1x4x256xf32> to vector<4x256xf32>
    %45 = vector.shape_cast %42 : vector<4x256xf32> to vector<1x1x1x4x256xf32>
    tpu.vector_store %arg5[%c0_22, %c0_23, %c1_24, %c0_25, %c0_26], %45 {strides = array<i32>} : memref<1x1x3x4x256xf32, #tpu.memory_space<vmem>>, vector<1x1x1x4x256xf32>,
    %c0_27 = arith.constant 0 : index
    %c0_28 = arith.constant 0 : index
    %c2 = arith.constant 2 : index
    %c0_29 = arith.constant 0 : index
    %c0_30 = arith.constant 0 : index
    %46 = vector.load %arg5[%c0_27, %c0_28, %c2, %c0_29, %c0_30] : memref<1x1x3x4x256xf32, #tpu.memory_space<vmem>>, vector<1x1x1x4x256xf32>
    %47 = vector.shape_cast %46 : vector<1x1x1x4x256xf32> to vector<4x256xf32>
    %48 = arith.addf %47, %33 : vector<4x256xf32>
    %c0_31 = arith.constant 0 : index
    %c0_32 = arith.constant 0 : index
    %c2_33 = arith.constant 2 : index
    %c0_34 = arith.constant 0 : index
    %c0_35 = arith.constant 0 : index
    %49 = vector.load %arg5[%c0_31, %c0_32, %c2_33, %c0_34, %c0_35] : memref<1x1x3x4x256xf32, #tpu.memory_space<vmem>>, vector<1x1x1x4x256xf32>
    %50 = vector.shape_cast %49 : vector<1x1x1x4x256xf32> to vector<4x256xf32>
    %51 = vector.shape_cast %48 : vector<4x256xf32> to vector<1x1x1x4x256xf32>
    tpu.vector_store %arg5[%c0_31, %c0_32, %c2_33, %c0_34, %c0_35], %51 {strides = array<i32>} : memref<1x1x3x4x256xf32, #tpu.memory_space<vmem>>, vector<1x1x1x4x256xf32>,
    return
  }
  func.func @transform_0(%arg0: i32, %arg1: i32, %arg2: i32) -> (i32, i32, i32) {
    %c1_i32 = arith.constant 1 : i32
    %0 = arith.muli %arg1, %c1_i32 : i32
    %1 = arith.addi %0, %arg2 : i32
    %c0_i32 = arith.constant 0 : i32
    %2 = arith.minsi %1, %c0_i32 : i32
    %c0_i32_0 = arith.constant 0 : i32
    %c0_i32_1 = arith.constant 0 : i32
    return %arg0, %c0_i32_0, %2 : i32, i32, i32
  }
  func.func @transform_1(%arg0: i32, %arg1: i32, %arg2: i32) -> (i32, i32, i32) {
    %c1_i32 = arith.constant 1 : i32
    %0 = arith.muli %arg1, %c1_i32 : i32
    %1 = arith.addi %0, %arg2 : i32
    %c0_i32 = arith.constant 0 : i32
    %2 = arith.minsi %1, %c0_i32 : i32
    %c0_i32_0 = arith.constant 0 : i32
    %c0_i32_1 = arith.constant 0 : i32
    return %arg0, %c0_i32_0, %2 : i32, i32, i32
  }
  func.func @transform_2(%arg0: i32, %arg1: i32, %arg2: i32) -> (i32, i32, i32, i32, i32) {
    %c0_i32 = arith.constant 0 : i32
    %c0_i32_0 = arith.constant 0 : i32
    %c0_i32_1 = arith.constant 0 : i32
    %c0_i32_2 = arith.constant 0 : i32
    return %arg0, %arg1, %c0_i32, %c0_i32_0, %c0_i32_1 : i32, i32, i32, i32, i32
  }
}

</mosaic_0001>

<bundles_post_ra>
// kernel: dice_loss_pallas.1
= control target key start
LH: loop header
LB: loop body
LE: loop exit
PB: predicated region body
PF: predicated region fallthrough
CT: control target
= control target key end

     0   :  { %s566_s9 = smov 0   ;;  %s568_s10 = smov 0   ;;  %s630_s0 = inlined_call_operand.vmem [shape: f32[2,4,256], index: 0, kind: input, shape index: {}]   ;;  %s631_s1 = inlined_call_operand.vmem [shape: s32[2,1,256], index: 1, kind: input, shape index: {}]   ;;  %s632_s2 = inlined_call_operand.vmem [shape: f32[2,1,3,4,256], index: 2, kind: output, shape index: {}]  }
   0x1   :  { %s570_s11 = smov 0  }
   0x2 LB: > { %s31_s12 = sadd.s32 1, %s544_s10  ;;  %p479_p0 = scmp.ge.s32.totalorder %s548_s11, 1  ;;  %s548_s11 = sphi %s570_s11, %s12_s11   ;;  %s544_s10 = sphi %s568_s10, %s634_s10   ;;  %s540_s9 = sphi %s566_s9, %s633_s9  }
   0x3   : > { %p33_p1 = scmp.ge.s32.totalorder %s31_s12, 2  ;;  %p180_p2 = scmp.lt.s32.totalorder %s548_s11, 3 }
   0x5   : > { %s636_s12 = smov (%p33_p1, %s31_s12), 0  ;;  %p181_p3 = pnand %p479_p0, %p180_p2 }
   0x6   : > { %p228_p4 = scmp.lt.s32.totalorder (!%p181_p3), %s540_s9, 1  ;;  %v271_v0 = vlaneseq (!%p181_p3)  ;;  %vm278_vm0 = vcmask (!%p181_p3), 1043456   ;;  %v550_v14 = vmov (!%p181_p3), 0.0  }
   0x7   : > { %184 = sbr.rel (%p181_p3) target bundleno = 86 (0x56), region = 28 }
   0x8   : > { %v586_v1 = vshrl.u32 (!%p181_p3), %v271_v0, 7 }
   0xa   : > { %v326_v2 = vsub.s32 (!%p181_p3), 0, %v586_v1  ;;  %v330_v3 = vsub.s32 (!%p181_p3), 1, %v586_v1 }
   0xe   : > { %s638_s9 = smov (!%p228_p4, %s540_s9), 1 }
   0xf   : > { %s492_s13 = sshll.u32 %s638_s9, 3  ;;  %s482_s17 = sshll.u32 %s638_s9, 1 }
  0x10   : > { %s235_s16 = scalar_lea.vmem %s630_s0, %s492_s13  ;;  %s250_s20 = scalar_lea.vmem %s631_s1, %s482_s17 }
  0x11   : > { %v273_v4 = vld [vmem:[%s235_s16] sm:$0xff]  ;;  %s493_s21 = smul.u32 24, %s638_s9 }
  0x12   : > { %v276_v5 = vcombine.high %v273_v4, %v273_v4  ;;  %v279_v6 = vsel %vm278_vm0, %v273_v4, -inf  ;;  %v274_v7 = vld [vmem:[%s250_s20] sm:$0x3] }
  0x13   : > { %v280_v8 = vrot.slane %v279_v6, 4  ;;  %v327_v9 = vrot.slane %v274_v7, %v326_v2  ;;  %v331_v10 = vrot.slane %v274_v7, %v330_v3  ;;  %s610_s24 = scalar_lea.vmem %s632_s2, %s493_s21 }
  0x14   : > { %v286_v11 = vsel %vm278_vm0, %v276_v5, -inf }
  0x15   : > { %v281_v12 = vmax.f32 %v279_v6, %v280_v8  ;;  %v287_v13 = vrot.slane %v286_v11, 4  ;;  %vm332_vm1 = vcmp.eq.s32.totalorder %v327_v9, %v586_v1  ;;  %vm333_vm2 = vcmp.eq.s32.totalorder %v331_v10, %v586_v1 }
  0x16   : > { %v484_v15 = vsel %vm332_vm1, 1.0, %v550_v14  ;;  %v485_v16 = vsel %vm333_vm2, 1.0, %v550_v14 }
  0x17   : > { %v282_v17 = vrot.slane %v281_v12, 2  ;;  %v288_v18 = vmax.f32 %v286_v11, %v287_v13  ;;  %v360_v19 = vcombine.low %v484_v15, %v485_v16 }
  0x19   : > { %v283_v20 = vmax.f32 %v281_v12, %v282_v17  ;;  %v289_v21 = vrot.slane %v288_v18, 2  ;;  %487 = vst [vmem:[%s610_s24 + $0x8] sm:$0xff] %v360_v19 }
  0x1b   : > { %v284_v22 = vrot.slane %v283_v20, 1  ;;  %v290_v23 = vmax.f32 %v288_v18, %v289_v21 }
  0x1d   : > { %v285_v24 = vmax.f32 %v283_v20, %v284_v22  ;;  %v291_v25 = vrot.slane %v290_v23, 1 }
  0x1f   : > { %v292_v26 = vmax.f32 %v290_v23, %v291_v25 }
  0x21   : > { %v295_v27 = vcombine.low %v285_v24, %v292_v26 }
  0x23   : > { %v297_v28 = vsub.f32 %v273_v4, %v295_v27 }
  0x25   : > { %v298_v29 = vmul.f32 1.442695, %v297_v28 }
  0x27   : > { %520 = vpow2.f32 %v298_v29 }
  0x31   : > { %v521_v30 = vpop.eup %520 }
  0x32   : > { %v301_v31 = vcombine.high %v521_v30, %v521_v30  ;;  %v303_v32 = vsel %vm278_vm0, %v521_v30, 0.0 }
  0x33   : > { %v304_v33 = vrot.slane %v303_v32, 4 }
  0x34   : > { %v310_v34 = vsel %vm278_vm0, %v301_v31, 0.0 }
  0x35   : > { %v305_v35 = vadd.f32 %v304_v33, %v303_v32  ;;  %v311_v36 = vrot.slane %v310_v34, 4 }
  0x37   : > { %v306_v37 = vrot.slane %v305_v35, 2  ;;  %v312_v38 = vadd.f32 %v311_v36, %v310_v34 }
  0x39   : > { %v307_v39 = vadd.f32 %v306_v37, %v305_v35  ;;  %v313_v40 = vrot.slane %v312_v38, 2 }
  0x3b   : > { %v308_v41 = vrot.slane %v307_v39, 1  ;;  %v314_v42 = vadd.f32 %v313_v40, %v312_v38 }
  0x3d   : > { %v309_v43 = vadd.f32 %v308_v41, %v307_v39  ;;  %v315_v44 = vrot.slane %v314_v42, 1 }
  0x3f   : > { %v316_v45 = vadd.f32 %v315_v44, %v314_v42  ;;  %522 = vrcp.f32 %v309_v43 }
  0x41   : > { %524 = vrcp.f32 %v316_v45 }
  0x49   : > { %v523_v46 = vpop.eup %522 }
  0x4b   : > { %v525_v47 = vpop.eup %524 }
  0x4c   : > { %v321_v48 = vcombine.low %v523_v46, %v525_v47 }
  0x4e   : > { %v323_v49 = vmul.f32 %v521_v30, %v321_v48 }
  0x50   : > { %v335_v50 = vcombine.high %v323_v49, %v323_v49  ;;  %v337_v51 = vsel %vm332_vm1, %v323_v49, 0.0  ;;  %v347_v52 = vmul.f32 %v323_v49, %v323_v49 }
  0x52   : > { %v338_v53 = vsel %vm333_vm2, %v335_v50, 0.0  ;;  %489 = vst [vmem:[%s610_s24 + $0x10] sm:$0xff] %v347_v52 }
  0x53   : > { %v352_v54 = vcombine.low %v337_v51, %v338_v53 }
  0x55   : > { %355 = vst [vmem:[%s610_s24] sm:$0xff] %v352_v54 }
  0x56 PF: > { %s12_s11 = sadd.s32 1, %s548_s11   ;;  %s633_s9 = smov %s544_s10 }
  0x57   : > { %p9_p5 = scmp.ge.s32.totalorder %s12_s11, 4   ;;  %s634_s10 = smov %s636_s12 }
  0x59   :  { %11 = sbr.rel (!%p9_p5) target bundleno = 2 (0x2), region = 67 }

</bundles_post_ra>
